<compile_context>
chip_gen: v5e
topology: v5e:2x2
jax: 0.10.0
libtpu: 0.0.40
codegen_flags: <defaults>
</compile_context>

<pallas_src>
import functools

import jax
import jax.numpy as jnp
from jax import lax
from jax.experimental import pallas as pl
from jax.experimental.pallas import tpu as pltpu


def _dual_loss_kernel(bins, num_bins, tile_s, chunk, s_total, needs_mask,
                      logit_ref, pred_ref, gt_ref, out_ref):
    """Per-(batch, tile) body.

    logit_ref: (num_bins, tile_s, 128)   pred_ref / gt_ref: (tile_s, 128)
    out_ref:   (3, 8, 128) per-batch accumulator [ce_sum, mse_sum, pred_sum].
    """
    t = pl.program_id(1)

    @pl.when(t == 0)
    def _():
        out_ref[...] = jnp.zeros_like(out_ref)

    n_full8 = (chunk // 8) * 8          # rows folding cleanly onto 8 sublanes
    rem8 = chunk - n_full8              # leftover rows (only for tiny tiles)

    def accumulate(slot, x):
        # x: (chunk, 128) f32, folded into the (8,128) accumulator row `slot`
        # via pure VPU elementwise adds (no XLU reduction in the hot loop).
        if n_full8:
            folded = x[:n_full8].reshape(n_full8 // 8, 8, 128).sum(axis=0)
            out_ref[slot, :, :] += folded
        if rem8:
            out_ref[slot, pl.ds(0, rem8), :] += x[n_full8:, :]

    def body(c, carry):
        start = pl.multiple_of(c * chunk, chunk)

        # Pass 1: running max over bins, one logits slab live at a time.
        m = logit_ref[0, pl.ds(start, chunk), :].astype(jnp.float32)
        for idx in range(1, num_bins):
            m = jnp.maximum(
                m, logit_ref[idx, pl.ds(start, chunk), :].astype(jnp.float32))

        gt = gt_ref[pl.ds(start, chunk), :].astype(jnp.float32)

        # Pass 2 (fused): sum-exp AND logit-at-gt-class in one sweep.
        # Default class is 0 (matches reference _bin_count: values in any gap
        # or out of range stay class 0; later bins overwrite earlier ones).
        l0 = logit_ref[0, pl.ds(start, chunk), :].astype(jnp.float32)
        se = jnp.exp(l0 - m)
        logit_at_cls = l0
        for idx in range(1, num_bins):
            li = logit_ref[idx, pl.ds(start, chunk), :].astype(jnp.float32)
            se = se + jnp.exp(li - m)
            lo, hi = bins[idx]
            logit_at_cls = jnp.where((gt >= lo) & (gt <= hi), li, logit_at_cls)

        ce = m + jnp.log(se) - logit_at_cls        # per-pixel cross entropy
        pred = pred_ref[pl.ds(start, chunk), :].astype(jnp.float32)
        diff = pred - gt
        sq = diff * diff

        if needs_mask:                              # only traced when needed
            row = (t * tile_s + start
                   + lax.broadcasted_iota(jnp.int32, (chunk, 128), 0))
            valid = row < s_total
            ce = jnp.where(valid, ce, 0.0)
            sq = jnp.where(valid, sq, 0.0)
            pred = jnp.where(valid, pred, 0.0)

        accumulate(0, ce)
        accumulate(1, sq)
        accumulate(2, pred)
        return carry

    lax.fori_loop(0, tile_s // chunk, body, 0, unroll=True)


def _choose_tile_s(S, num_bins, itemsize, budget=2 << 20, chunk_target=64):
    """Sublane tile size under a ~2 MiB single-buffered VMEM budget."""
    bytes_per_row = (num_bins + 2) * 128 * itemsize
    max_rows = max(8, (budget // bytes_per_row) // 8 * 8)
    if S <= chunk_target:
        return S                        # single tiny full-extent tile
    s8 = -(-S // 8) * 8                 # round up to a sublane multiple
    if s8 <= max_rows:
        return s8                       # one (possibly tail-masked) tile
    for ts in range(max_rows, 7, -8):   # largest mult-of-8 divisor that fits
        if S % ts == 0:
            return ts
    return max_rows                     # cap; last tile is partial + masked


def _choose_chunk(tile_s, target=64):
    """Inner streaming chunk (rows) — bounds the live vreg set."""
    if tile_s <= target:
        return tile_s
    for ch in range(target, 7, -8):     # tile_s > target  =>  tile_s % 8 == 0
        if tile_s % ch == 0:
            return ch
    return 8                            # unreachable, kept for safety


class DualLossPallas:
    """DualLoss forward pass with cls_loss='ce', reg_loss='mse'."""

    def __init__(self, input_size, block_size, bins, bin_centers,
                 weight_cls=0.1, weight_reg=0.1):
        assert len(bins) == len(bin_centers) >= 2
        assert all(len(b) == 2 for b in bins)
        assert all(b[0] <= p <= b[1] for b, p in zip(bins, bin_centers))
        self.input_size = input_size
        self.block_size = block_size
        self.num_blocks_h = input_size // block_size
        self.num_blocks_w = input_size // block_size
        self.bins = [(float(lo), float(hi)) for lo, hi in bins]
        self.num_bins = len(bins)
        # cls_loss == 'ce'  -> weight_cls forced to 1.0 (as in the reference)
        self.weight_cls = 1.0
        # reg_loss == 'mse' -> weight_reg kept as given
        self.weight_reg = float(weight_reg)

    def __call__(self, pred_logit_map, pred_den_map, gt_den_map, gt_points):
        B = pred_logit_map.shape[0]
        H, W = self.num_blocks_h, self.num_blocks_w
        HW = H * W
        assert pred_logit_map.shape == (B, self.num_bins, H, W)
        if gt_den_map.shape[-2:] == (self.input_size, self.input_size):
            # Count-preserving sum pooling (reference _reshape_density).
            bs = self.block_size
            gt_den_map = gt_den_map.reshape(B, 1, H, bs, W, bs).sum(axis=(3, 5))
        assert pred_den_map.shape == gt_den_map.shape == (B, 1, H, W)
        assert len(gt_points) == B
        assert HW % 128 == 0, "H*W must be a multiple of 128 (lane-dense layout)"

        S = HW // 128
        itemsize = jnp.dtype(pred_logit_map.dtype).itemsize
        tile_s = _choose_tile_s(S, self.num_bins, itemsize)
        chunk = _choose_chunk(tile_s)
        num_tiles = -(-S // tile_s)
        needs_mask = (num_tiles * tile_s != S)

        # Lane/sublane-dense layouts; dtype upcast happens inside the kernel,
        # so callers may pass bf16 to halve HBM traffic on v5e/v6e.
        logit = pred_logit_map.reshape(B, self.num_bins, S, 128)
        pred = pred_den_map.reshape(B, S, 128)
        gt = gt_den_map.reshape(B, S, 128)

        kernel = functools.partial(_dual_loss_kernel, self.bins, self.num_bins,
                                   tile_s, chunk, S, needs_mask)

        bytes_accessed = (B * self.num_bins * HW * itemsize
                          + B * HW * jnp.dtype(pred.dtype).itemsize
                          + B * HW * jnp.dtype(gt.dtype).itemsize
                          + B * 3 * 8 * 128 * 4)
        cost = pl.CostEstimate(
            flops=int(B * HW * (8 * self.num_bins + 16)),
            transcendentals=int(B * HW * (self.num_bins + 1)),
            bytes_accessed=int(bytes_accessed))

        out = pl.pallas_call(
            kernel,
            out_shape=jax.ShapeDtypeStruct((B, 3, 8, 128), jnp.float32),
            grid=(B, num_tiles),
            in_specs=[
                pl.BlockSpec((None, self.num_bins, tile_s, 128),
                             lambda b, t: (b, 0, t, 0)),                # logits
                pl.BlockSpec((None, tile_s, 128),
                             lambda b, t: (b, t, 0)),                   # pred
                pl.BlockSpec((None, tile_s, 128),
                             lambda b, t: (b, t, 0)),                   # gt
            ],
            out_specs=pl.BlockSpec((None, 3, 8, 128),
                                   lambda b, t: (b, 0, 0, 0)),
            compiler_params=pltpu.CompilerParams(
                dimension_semantics=("parallel", "arbitrary")),
            cost_estimate=cost,
        )(logit, pred, gt)

        # Single cross-lane/sublane reduction, once per batch, on a tiny slab.
        sums = out.sum(axis=(-1, -2))                  # (B, 3)
        cls_loss = sums[:, 0].mean()                   # spatial sum, batch mean
        reg_loss = sums[:, 1].mean()
        gt_cnt = jnp.asarray([int(p.shape[0]) for p in gt_points], jnp.float32)
        cnt_loss = jnp.abs(sums[:, 2] - gt_cnt).mean()
        total = (self.weight_cls * cls_loss
                 + self.weight_reg * reg_loss
                 + cnt_loss)
        loss_info = {
            "cls_ce_loss": cls_loss,
            "cnt_loss": cnt_loss,
            "reg_mse_loss": reg_loss,
            "total_loss": total,
        }
        loss_info = dict(sorted(loss_info.items()))
        return total, loss_info


if __name__ == "__main__":
    # Small shapes: input_size=64, block_size=4 -> 16x16 block grid; 4 bins; B=2.
    input_size, block_size = 64, 4
    bins = [(0.0, 0.0), (1e-6, 0.5), (0.5, 1.0), (1.0, 8.0)]
    bin_centers = [0.0, 0.25, 0.75, 2.0]
    B, num_bins = 2, len(bins)
    Hb = Wb = input_size // block_size

    key = jax.random.PRNGKey(0)
    k1, k2, k3, k4, k5 = jax.random.split(key, 5)
    pred_logit_map = jax.random.normal(k1, (B, num_bins, Hb, Wb), jnp.float32)
    pred_den_map = jnp.abs(jax.random.normal(k2, (B, 1, Hb, Wb), jnp.float32))
    gt_den_map = jnp.abs(jax.random.normal(k3, (B, 1, Hb, Wb), jnp.float32)) * 0.8
    # gt_points: only their lengths are used (gt counts).
    gt_points = [
        jax.random.uniform(k4, (5, 2), jnp.float32, 0.0, input_size),
        jax.random.uniform(k5, (9, 2), jnp.float32, 0.0, input_size),
    ]

    loss_fn = DualLossPallas(input_size=input_size, block_size=block_size,
                             bins=bins, bin_centers=bin_centers,
                             weight_cls=0.1, weight_reg=0.1)
    total_loss, loss_info = loss_fn(pred_logit_map, pred_den_map, gt_den_map,
                                    gt_points)
    jax.block_until_ready(total_loss)
    for v in loss_info.values():
        jax.block_until_ready(v)
    print("KERNEL_OK")
</pallas_src>

<mosaic_0001>
module attributes {stable_mosaic.version = 11 : i64} {
  func.func @_dual_loss_kernel(%arg0: i32, %arg1: i32, %arg2: memref<1x4x2x128xf32, #tpu.memory_space<vmem>>, %arg3: memref<1x2x128xf32, #tpu.memory_space<vmem>>, %arg4: memref<1x2x128xf32, #tpu.memory_space<vmem>>, %arg5: memref<1x3x8x128xf32, #tpu.memory_space<vmem>>) attributes {dimension_semantics = [#tpu.dimension_semantics<parallel>, #tpu.dimension_semantics<arbitrary>], iteration_bounds = array<i64: 2, 1>, scalar_prefetch = 0 : i64, scratch_operands = 0 : i64, tpu.core_type = #tpu.core_type<tc>, window_params = [{transform_indices = @transform_0, window_bounds = array<i64: 1, 4, 2, 128>}, {transform_indices = @transform_1, window_bounds = array<i64: 1, 2, 128>}, {transform_indices = @transform_2, window_bounds = array<i64: 1, 2, 128>}, {transform_indices = @transform_3, window_bounds = array<i64: 1, 3, 8, 128>}]} {
    %c0_i32 = arith.constant 0 : i32
    %0 = arith.cmpi eq, %arg1, %c0_i32 : i32
    %1 = arith.extui %0 : i1 to i32
    %c0_i32_0 = arith.constant 0 : i32
    %2 = arith.cmpi ne, %1, %c0_i32_0 : i32
    scf.if %2 {
      %cst_55 = arith.constant 0.000000e+00 : f32
      %90 = vector.broadcast %cst_55 : f32 to vector<3x8x128xf32>
      %c0_56 = arith.constant 0 : index
      %c0_57 = arith.constant 0 : index
      %c0_58 = arith.constant 0 : index
      %c0_59 = arith.constant 0 : index
      %91 = vector.load %arg5[%c0_56, %c0_57, %c0_58, %c0_59] : memref<1x3x8x128xf32, #tpu.memory_space<vmem>>, vector<1x3x8x128xf32>
      %92 = vector.shape_cast %91 : vector<1x3x8x128xf32> to vector<3x8x128xf32>
      %93 = vector.shape_cast %90 : vector<3x8x128xf32> to vector<1x3x8x128xf32>
      tpu.vector_store %arg5[%c0_56, %c0_57, %c0_58, %c0_59], %93 {strides = array<i32>} : memref<1x3x8x128xf32, #tpu.memory_space<vmem>>, vector<1x3x8x128xf32>,
    } else {
    }
    %c0_i32_1 = arith.constant 0 : i32
    %c2_i32 = arith.constant 2 : i32
    %3 = arith.muli %c0_i32_1, %c2_i32 : i32
    %4 = tpu.assume_multiple %3, 2 : i32
    %c0 = arith.constant 0 : index
    %c0_2 = arith.constant 0 : index
    %5 = arith.index_cast %4 : i32 to index
    %c0_3 = arith.constant 0 : index
    %6 = vector.load %arg2[%c0, %c0_2, %5, %c0_3] : memref<1x4x2x128xf32, #tpu.memory_space<vmem>>, vector<1x1x2x128xf32>
    %7 = vector.shape_cast %6 : vector<1x1x2x128xf32> to vector<2x128xf32>
    %c0_4 = arith.constant 0 : index
    %c1 = arith.constant 1 : index
    %8 = arith.index_cast %4 : i32 to index
    %c0_5 = arith.constant 0 : index
    %9 = vector.load %arg2[%c0_4, %c1, %8, %c0_5] : memref<1x4x2x128xf32, #tpu.memory_space<vmem>>, vector<1x1x2x128xf32>
    %10 = vector.shape_cast %9 : vector<1x1x2x128xf32> to vector<2x128xf32>
    %11 = arith.maximumf %7, %10 : vector<2x128xf32>
    %c0_6 = arith.constant 0 : index
    %c2 = arith.constant 2 : index
    %12 = arith.index_cast %4 : i32 to index
    %c0_7 = arith.constant 0 : index
    %13 = vector.load %arg2[%c0_6, %c2, %12, %c0_7] : memref<1x4x2x128xf32, #tpu.memory_space<vmem>>, vector<1x1x2x128xf32>
    %14 = vector.shape_cast %13 : vector<1x1x2x128xf32> to vector<2x128xf32>
    %15 = arith.maximumf %11, %14 : vector<2x128xf32>
    %c0_8 = arith.constant 0 : index
    %c3 = arith.constant 3 : index
    %16 = arith.index_cast %4 : i32 to index
    %c0_9 = arith.constant 0 : index
    %17 = vector.load %arg2[%c0_8, %c3, %16, %c0_9] : memref<1x4x2x128xf32, #tpu.memory_space<vmem>>, vector<1x1x2x128xf32>
    %18 = vector.shape_cast %17 : vector<1x1x2x128xf32> to vector<2x128xf32>
    %19 = arith.maximumf %15, %18 : vector<2x128xf32>
    %c0_10 = arith.constant 0 : index
    %20 = arith.index_cast %4 : i32 to index
    %c0_11 = arith.constant 0 : index
    %21 = vector.load %arg4[%c0_10, %20, %c0_11] : memref<1x2x128xf32, #tpu.memory_space<vmem>>, vector<1x2x128xf32>
    %22 = vector.shape_cast %21 : vector<1x2x128xf32> to vector<2x128xf32>
    %c0_12 = arith.constant 0 : index
    %c0_13 = arith.constant 0 : index
    %23 = arith.index_cast %4 : i32 to index
    %c0_14 = arith.constant 0 : index
    %24 = vector.load %arg2[%c0_12, %c0_13, %23, %c0_14] : memref<1x4x2x128xf32, #tpu.memory_space<vmem>>, vector<1x1x2x128xf32>
    %25 = vector.shape_cast %24 : vector<1x1x2x128xf32> to vector<2x128xf32>
    %26 = arith.subf %25, %19 : vector<2x128xf32>
    %27 = math.exp %26 : vector<2x128xf32>
    %c0_15 = arith.constant 0 : index
    %c1_16 = arith.constant 1 : index
    %28 = arith.index_cast %4 : i32 to index
    %c0_17 = arith.constant 0 : index
    %29 = vector.load %arg2[%c0_15, %c1_16, %28, %c0_17] : memref<1x4x2x128xf32, #tpu.memory_space<vmem>>, vector<1x1x2x128xf32>
    %30 = vector.shape_cast %29 : vector<1x1x2x128xf32> to vector<2x128xf32>
    %31 = arith.subf %30, %19 : vector<2x128xf32>
    %32 = math.exp %31 : vector<2x128xf32>
    %33 = arith.addf %27, %32 : vector<2x128xf32>
    %cst = arith.constant 9.99999997E-7 : f32
    %34 = vector.broadcast %cst : f32 to vector<2x128xf32>
    %35 = arith.cmpf oge, %22, %34 : vector<2x128xf32>
    %cst_18 = arith.constant 5.000000e-01 : f32
    %36 = vector.broadcast %cst_18 : f32 to vector<2x128xf32>
    %37 = arith.cmpf ole, %22, %36 : vector<2x128xf32>
    %38 = arith.andi %35, %37 : vector<2x128xi1>
    %39 = arith.select %38, %30, %25 : vector<2x128xi1>, vector<2x128xf32>
    %c0_19 = arith.constant 0 : index
    %c2_20 = arith.constant 2 : index
    %40 = arith.index_cast %4 : i32 to index
    %c0_21 = arith.constant 0 : index
    %41 = vector.load %arg2[%c0_19, %c2_20, %40, %c0_21] : memref<1x4x2x128xf32, #tpu.memory_space<vmem>>, vector<1x1x2x128xf32>
    %42 = vector.shape_cast %41 : vector<1x1x2x128xf32> to vector<2x128xf32>
    %43 = arith.subf %42, %19 : vector<2x128xf32>
    %44 = math.exp %43 : vector<2x128xf32>
    %45 = arith.addf %33, %44 : vector<2x128xf32>
    %cst_22 = arith.constant 5.000000e-01 : f32
    %46 = vector.broadcast %cst_22 : f32 to vector<2x128xf32>
    %47 = arith.cmpf oge, %22, %46 : vector<2x128xf32>
    %cst_23 = arith.constant 1.000000e+00 : f32
    %48 = vector.broadcast %cst_23 : f32 to vector<2x128xf32>
    %49 = arith.cmpf ole, %22, %48 : vector<2x128xf32>
    %50 = arith.andi %47, %49 : vector<2x128xi1>
    %51 = arith.select %50, %42, %39 : vector<2x128xi1>, vector<2x128xf32>
    %c0_24 = arith.constant 0 : index
    %c3_25 = arith.constant 3 : index
    %52 = arith.index_cast %4 : i32 to index
    %c0_26 = arith.constant 0 : index
    %53 = vector.load %arg2[%c0_24, %c3_25, %52, %c0_26] : memref<1x4x2x128xf32, #tpu.memory_space<vmem>>, vector<1x1x2x128xf32>
    %54 = vector.shape_cast %53 : vector<1x1x2x128xf32> to vector<2x128xf32>
    %55 = arith.subf %54, %19 : vector<2x128xf32>
    %56 = math.exp %55 : vector<2x128xf32>
    %57 = arith.addf %45, %56 : vector<2x128xf32>
    %cst_27 = arith.constant 1.000000e+00 : f32
    %58 = vector.broadcast %cst_27 : f32 to vector<2x128xf32>
    %59 = arith.cmpf oge, %22, %58 : vector<2x128xf32>
    %cst_28 = arith.constant 8.000000e+00 : f32
    %60 = vector.broadcast %cst_28 : f32 to vector<2x128xf32>
    %61 = arith.cmpf ole, %22, %60 : vector<2x128xf32>
    %62 = arith.andi %59, %61 : vector<2x128xi1>
    %63 = arith.select %62, %54, %51 : vector<2x128xi1>, vector<2x128xf32>
    %64 = math.log %57 : vector<2x128xf32>
    %65 = arith.addf %19, %64 : vector<2x128xf32>
    %66 = arith.subf %65, %63 : vector<2x128xf32>
    %c0_29 = arith.constant 0 : index
    %67 = arith.index_cast %4 : i32 to index
    %c0_30 = arith.constant 0 : index
    %68 = vector.load %arg3[%c0_29, %67, %c0_30] : memref<1x2x128xf32, #tpu.memory_space<vmem>>, vector<1x2x128xf32>
    %69 = vector.shape_cast %68 : vector<1x2x128xf32> to vector<2x128xf32>
    %70 = arith.subf %69, %22 : vector<2x128xf32>
    %71 = arith.mulf %70, %70 : vector<2x128xf32>
    %c0_31 = arith.constant 0 : index
    %c0_32 = arith.constant 0 : index
    %c0_33 = arith.constant 0 : index
    %c0_34 = arith.constant 0 : index
    %72 = vector.load %arg5[%c0_31, %c0_32, %c0_33, %c0_34] : memref<1x3x8x128xf32, #tpu.memory_space<vmem>>, vector<1x1x2x128xf32>
    %73 = vector.shape_cast %72 : vector<1x1x2x128xf32> to vector<2x128xf32>
    %74 = arith.addf %73, %66 : vector<2x128xf32>
    %c0_35 = arith.constant 0 : index
    %c0_36 = arith.constant 0 : index
    %c0_37 = arith.constant 0 : index
    %c0_38 = arith.constant 0 : index
    %75 = vector.load %arg5[%c0_35, %c0_36, %c0_37, %c0_38] : memref<1x3x8x128xf32, #tpu.memory_space<vmem>>, vector<1x1x2x128xf32>
    %76 = vector.shape_cast %75 : vector<1x1x2x128xf32> to vector<2x128xf32>
    %77 = vector.shape_cast %74 : vector<2x128xf32> to vector<1x1x2x128xf32>
    tpu.vector_store %arg5[%c0_35, %c0_36, %c0_37, %c0_38], %77 {strides = array<i32>} : memref<1x3x8x128xf32, #tpu.memory_space<vmem>>, vector<1x1x2x128xf32>,
    %c0_39 = arith.constant 0 : index
    %c1_40 = arith.constant 1 : index
    %c0_41 = arith.constant 0 : index
    %c0_42 = arith.constant 0 : index
    %78 = vector.load %arg5[%c0_39, %c1_40, %c0_41, %c0_42] : memref<1x3x8x128xf32, #tpu.memory_space<vmem>>, vector<1x1x2x128xf32>
    %79 = vector.shape_cast %78 : vector<1x1x2x128xf32> to vector<2x128xf32>
    %80 = arith.addf %79, %71 : vector<2x128xf32>
    %c0_43 = arith.constant 0 : index
    %c1_44 = arith.constant 1 : index
    %c0_45 = arith.constant 0 : index
    %c0_46 = arith.constant 0 : index
    %81 = vector.load %arg5[%c0_43, %c1_44, %c0_45, %c0_46] : memref<1x3x8x128xf32, #tpu.memory_space<vmem>>, vector<1x1x2x128xf32>
    %82 = vector.shape_cast %81 : vector<1x1x2x128xf32> to vector<2x128xf32>
    %83 = vector.shape_cast %80 : vector<2x128xf32> to vector<1x1x2x128xf32>
    tpu.vector_store %arg5[%c0_43, %c1_44, %c0_45, %c0_46], %83 {strides = array<i32>} : memref<1x3x8x128xf32, #tpu.memory_space<vmem>>, vector<1x1x2x128xf32>,
    %c0_47 = arith.constant 0 : index
    %c2_48 = arith.constant 2 : index
    %c0_49 = arith.constant 0 : index
    %c0_50 = arith.constant 0 : index
    %84 = vector.load %arg5[%c0_47, %c2_48, %c0_49, %c0_50] : memref<1x3x8x128xf32, #tpu.memory_space<vmem>>, vector<1x1x2x128xf32>
    %85 = vector.shape_cast %84 : vector<1x1x2x128xf32> to vector<2x128xf32>
    %86 = arith.addf %85, %69 : vector<2x128xf32>
    %c0_51 = arith.constant 0 : index
    %c2_52 = arith.constant 2 : index
    %c0_53 = arith.constant 0 : index
    %c0_54 = arith.constant 0 : index
    %87 = vector.load %arg5[%c0_51, %c2_52, %c0_53, %c0_54] : memref<1x3x8x128xf32, #tpu.memory_space<vmem>>, vector<1x1x2x128xf32>
    %88 = vector.shape_cast %87 : vector<1x1x2x128xf32> to vector<2x128xf32>
    %89 = vector.shape_cast %86 : vector<2x128xf32> to vector<1x1x2x128xf32>
    tpu.vector_store %arg5[%c0_51, %c2_52, %c0_53, %c0_54], %89 {strides = array<i32>} : memref<1x3x8x128xf32, #tpu.memory_space<vmem>>, vector<1x1x2x128xf32>,
    %c1_i32 = arith.constant 1 : i32
    return
  }
  func.func @transform_0(%arg0: i32, %arg1: i32) -> (i32, i32, i32, i32) {
    %c0_i32 = arith.constant 0 : i32
    %c0_i32_0 = arith.constant 0 : i32
    %c0_i32_1 = arith.constant 0 : i32
    return %arg0, %c0_i32, %arg1, %c0_i32_0 : i32, i32, i32, i32
  }
  func.func @transform_1(%arg0: i32, %arg1: i32) -> (i32, i32, i32) {
    %c0_i32 = arith.constant 0 : i32
    %c0_i32_0 = arith.constant 0 : i32
    return %arg0, %arg1, %c0_i32 : i32, i32, i32
  }
  func.func @transform_2(%arg0: i32, %arg1: i32) -> (i32, i32, i32) {
    %c0_i32 = arith.constant 0 : i32
    %c0_i32_0 = arith.constant 0 : i32
    return %arg0, %arg1, %c0_i32 : i32, i32, i32
  }
  func.func @transform_3(%arg0: i32, %arg1: i32) -> (i32, i32, i32, i32) {
    %c0_i32 = arith.constant 0 : i32
    %c0_i32_0 = arith.constant 0 : i32
    %c0_i32_1 = arith.constant 0 : i32
    %c0_i32_2 = arith.constant 0 : i32
    return %arg0, %c0_i32, %c0_i32_0, %c0_i32_1 : i32, i32, i32, i32
  }
}

</mosaic_0001>

<bundles_post_ra>
// kernel: tpu_custom_call.1
= control target key start
LH: loop header
LB: loop body
LE: loop exit
PB: predicated region body
PF: predicated region fallthrough
CT: control target
= control target key end

     0   :  { %s994_s0 = inlined_call_operand.hbm [shape: f32[2,4,2,128], index: 0, kind: input, shape index: {}]   ;;  %s995_s1 = inlined_call_operand.hbm [shape: f32[2,2,128], index: 1, kind: input, shape index: {}]   ;;  %s996_s2 = inlined_call_operand.hbm [shape: f32[2,2,128], index: 2, kind: input, shape index: {}]   ;;  %s997_s3 = inlined_call_operand.hbm [shape: f32[2,3,8,128], index: 3, kind: output, shape index: {}]  }
   0x1   :  { %1001 = sst [smem:[#allocation15_spill]] %s995_s1 }
   0x2   :  { %1002 = sst [smem:[#allocation16_spill]] %s996_s2 }
   0x3   :  { %8 = vsyncpa [#allocation3], 0 }
   0x4   :  { %10 = vsyncpa [#allocation3 + $0x1], 0 }
   0x5   :  { %11 = vsyncpa [#allocation6], 0 }
   0x6   :  { %13 = vsyncpa [#allocation6 + $0x1], 0 }
   0x7   :  { %14 = vsyncpa [#allocation4], 0 }
   0x8   :  { %16 = vsyncpa [#allocation4 + $0x1], 0  ;;  %s818_s12 = smov 0   ;;  %s820_s13 = smov 0  }
   0x9   :  { %s822_s14 = smov 0   ;;  %s824_s15 = smov 0  }
   0xa   :  { %s826_s16 = smov 0   ;;  %s828_s17 = smov 0  }
   0xb LB: > { %1003 = sst [smem:[#allocation12_spill]] %s779_s14  ;;  %s849_s18 = sadd.s32 4294967295, %s791_s17   ;;  %s791_s17 = sphi %s828_s17, %s22_s17   ;;  %s787_s16 = sphi %s826_s16, %s1021_s16   ;;  %s783_s15 = sphi %s824_s15, %s1020_s15   ;;  %s779_s14 = sphi %s822_s14, %s1016_s14   ;;  %s775_s13 = sphi %s820_s13, %s1019_s13   ;;  %s771_s12 = sphi %s818_s12, %s1018_s12  }
   0xc   : > { %s501_s19 = sadd.s32 4294967294, %s791_s17   ;;  %s34_s20 = sadd.s32 1, %s787_s16 }
   0xd   : > { %s43_s21 = sadd.s32 1, %s779_s14  ;;  %p36_p0 = scmp.ge.s32.totalorder %s34_s20, 2 }
   0xe   : > { %p50_p1 = scmp.ne.s32.totalorder %s779_s14, %s775_s13  ;;  %p51_p2 = scmp.eq.s32.totalorder %s791_s17, 0 }
   0xf   : > { %p56_p3 = scmp.ne.s32.totalorder %s775_s13, %s771_s12  ;;  %s1023_s20 = smov (%p36_p0, %s34_s20), 0 }
  0x10   : > { %1004 = sst [smem:[#allocation13_spill]] %s1023_s20  ;;  %p861_p4 = por %p51_p2, %p50_p1 }
  0x11   : > { %p57_p5 = scmp.eq.s32.totalorder %s849_s18, 0  ;;  %s38_s23 = ssub.s32 %s787_s16, %s1023_s20 }
  0x12   : > { %p136_p6 = scmp.eq.s32.totalorder %s849_s18, 1  ;;  %p41_p7 = scmp.eq.s32.totalorder %s38_s23, 0 }
  0x13   : > { %p869_p8 = por %p57_p5, %p56_p3  ;;  %p142_p10 = scmp.eq.s32.totalorder %s501_s19, 1 }
  0x14   : > { %p873_p9 = por %p136_p6, %p50_p1  ;;  %p503_p12 = scmp.ge.s32.totalorder %s791_s17, 2 }
  0x15   : > { %s878_s26 = scalar_select %p41_p7, %s779_s14, %s43_s21  }
  0x16   : > { %p880_p11 = por %p142_p10, %p56_p3  ;;  %p550_p13 = scmp.lt.s32.totalorder %s791_s17, 2 }
  0x17   : > { %1008 = sst [smem:[#allocation14_spill]] %s878_s26  ;;  %s887_s28 = sand.u32 1, %s779_s14  }
  0x18   : > { %s185_s29 = sand.u32 1, %s791_s17   ;;  %s998_s30 = sshll.u32 %s887_s28, 1 }
  0x19   : > { %p893_p0 = pnand %p550_p13, %p861_p4  ;;  %s508_s5 = sshll.u32 %s787_s16, 1 }
  0x1a   : > { %s1011_s1 = sld [smem:[#allocation15_spill]]  ;;  %s189_s10 = scalar_lea.vmem [#allocation5], %s998_s30 }
  0x1b   : > { %s198_s11 = sshll.u32 %s189_s10, 4  ;;  %s186_s19 = scalar_lea.sflag [#allocation6], %s185_s29  ;;  %s199_s11 = int_to_ptr.vmem [resolvable:$true] %s198_s11 }
  0x1c   : > { %s1012_s2 = sld [smem:[#allocation16_spill]]  ;;  %p511_p1 = scmp.ge.s32.totalorder %s791_s17, 1 }
  0x1d   : > { %p223_p2 = scmp.lt.s32.totalorder %s791_s17, 3  ;;  %s504_s7 = sshll.u32 %s887_s28, 3 }
  0x1e   : > { %s793_s21 = smov 32   ;;  %s794_s22 = smov 2  }
  0x1f   : > { %p910_p3 = pnand %p511_p1, %p223_p2  ;;  %s1014_s20 = sshll.u32 %s887_s28, 1 }
  0x20   : > { %s194_s8 = scalar_lea.hbm %s1011_s1, %s508_s5  ;;  %s209_s26 = scalar_lea.vmem [#allocation7], %s1014_s20 }
  0x21   : > { %s196_s9 = sshll.u32 %s194_s8, 4  ;;  %s525_s8 = sshll.u32 %s787_s16, 3  ;;  %s197_s9 = int_to_ptr.hbm [resolvable:$true] %s196_s9 }
  0x22   : > { %542 = dma.hbm_to_vmem [thread:$0]  (!%p893_p0), %s197_s9, 32, %s199_s11, %s186_s19  }
  0x23   : > { %s214_s23 = scalar_lea.hbm %s1012_s2, %s508_s5  ;;  %s172_s29 = scalar_lea.hbm %s994_s0, %s525_s8 }
  0x24   : > { %s173_s9 = sshll.u32 %s172_s29, 4  ;;  %s166_s11 = scalar_lea.vmem [#allocation2], %s504_s7  ;;  %s174_s9 = int_to_ptr.hbm [resolvable:$true] %s173_s9 }
  0x25   : > { %s175_s1 = sshll.u32 %s166_s11, 4  ;;  %s163_s5 = scalar_lea.sflag [#allocation3], %s887_s28  ;;  %s176_s1 = int_to_ptr.vmem [resolvable:$true] %s175_s1 }
  0x26   : > { %539 = dma.hbm_to_vmem [thread:$0]  (!%p893_p0), %s174_s9, 128, %s176_s1, %s163_s5, %s793_s21, %s793_s21, %s794_s22  }
  0x27   : > { %s216_s2 = sshll.u32 %s214_s23, 4  ;;  %s218_s14 = sshll.u32 %s209_s26, 4  ;;  %s217_s2 = int_to_ptr.hbm [resolvable:$true] %s216_s2  ;;  %s219_s14 = int_to_ptr.vmem [resolvable:$true] %s218_s14 }
  0x28   : > { %545 = dma.hbm_to_vmem [thread:$0]  (!%p893_p0), %s217_s2, 32, %s219_s14, %s186_s19  }
  0x29   : > { %227 = sbr.rel (%p910_p3) target bundleno = 95 (0x5f), region = 32  ;;  %s929_s30 = sand.u32 (!%p910_p3), 1, %s775_s13  }
  0x2a   : > { %s512_s7 = sshll.u32 (!%p910_p3), %s929_s30, 3  ;;  %s230_s8 = scalar_lea.sflag (!%p910_p3), [#allocation3], %s929_s30 }
  0x2b   : > { %s233_s1 = scalar_lea.vmem (!%p910_p3), [#allocation2], %s512_s7 }
  0x2e   : > { %758 = dma.done.wait (%p869_p8), %s230_s8, 128  }
  0x2f   : > { %760 = vsyncadd (%p869_p8), %s230_s8, 4294967168  ;;  %s239_s2 = sand.u32 1, %s849_s18   ;;  %s513_s14 = sshll.u32 %s929_s30, 1 }
  0x30   : > { %s240_s20 = scalar_lea.sflag [#allocation6], %s239_s2  ;;  %s243_s26 = scalar_lea.vmem [#allocation5], %s513_s14 }
  0x31   : > { %762 = dma.done.wait (%p869_p8), %s240_s20, 64  }
  0x32   : > { %764 = vsyncadd (%p869_p8), %s240_s20, 4294967232  ;;  %s526_s28 = smul.u32 24, %s929_s30  ;;  %v795_v0 = vmov 0.0   ;;  %v294_v1 = vld [vmem:[%s233_s1] sm:$0x3]  ;;  %s253_s18 = scalar_lea.vmem [#allocation7], %s513_s14 }
  0x33   : > { %v515_v2 = vld [vmem:[%s233_s1 + $0x2] sm:$0x3]  ;;  %v516_v3 = vld [vmem:[%s233_s1 + $0x4] sm:$0x3]  ;;  %v339_v5 = vld [vmem:[%s243_s26] sm:$0x3] }
  0x34   : > { %s944_s4 = scalar_lea.vmem [#allocation8], %s526_s28  ;;  %v298_v4 = vmax.f32 %v294_v1, %v515_v2  ;;  %v517_v6 = vld [vmem:[%s233_s1 + $0x6] sm:$0x3]  ;;  %v307_v7 = vld [vmem:[%s253_s18] sm:$0x3]  ;;  %s527_s24 = smul.u32 24, %s783_s15 }
  0x35   : > { %291 = vst [vmem:[%s944_s4] sm:$0xff] %v795_v0  ;;  %v340_v9 = vsub.f32 %v339_v5, %v307_v7  ;;  %vm315_vm0 = vcmp.ge.f32.partialorder %v307_v7, 1e-06  ;;  %vm316_vm1 = vcmp.le.f32.partialorder %v307_v7, 0.5  ;;  %vm323_vm3 = vcmp.ge.f32.partialorder %v307_v7, 0.5  ;;  %s366_s10 = sshll.u32 %s944_s4, 4  ;;  %s354_s15 = scalar_lea.sflag [#allocation4], %s929_s30  ;;  %s367_s10 = int_to_ptr.vmem [resolvable:$true] %s366_s10 }
  0x36   : > { %292 = vst [vmem:[%s944_s4 + $0x8] sm:$0xff] %v795_v0  ;;  %v302_v8 = vmax.f32 %v298_v4, %v516_v3  ;;  %vm317_vm2 = vmand %vm315_vm0, %vm316_vm1  ;;  %vm324_vm4 = vcmp.le.f32.partialorder %v307_v7, 1.0  ;;  %vm331_vm6 = vcmp.ge.f32.partialorder %v307_v7, 1.0  ;;  %vm332_vm7 = vcmp.le.f32.partialorder %v307_v7, 8.0  ;;  %s365_s6 = scalar_lea.hbm %s997_s3, %s527_s24  ;;  %s725_s22 = scalar_lea.hbm %s997_s3, 48 }
  0x37   : > { %293 = vst [vmem:[%s944_s4 + $0x10] sm:$0xff] %v795_v0  ;;  %v341_v11 = vmul.f32 %v340_v9, %v340_v9  ;;  %v318_v31 = vsel %vm317_vm2, %v515_v2, %v294_v1  ;;  %vm325_vm5 = vmand %vm323_vm3, %vm324_vm4  ;;  %s368_s29 = sshll.u32 %s365_s6, 4  ;;  %s369_s29 = int_to_ptr.hbm [resolvable:$true] %s368_s29 }
  0x38   : > { %v306_v10 = vmax.f32 %v302_v8, %v517_v6  ;;  %v326_v32 = vsel %vm325_vm5, %v516_v3, %v318_v31  ;;  %vm333_vm8 = vmand %vm331_vm6, %vm332_vm7  ;;  %s719_s9 = sshra.s32 %s369_s29, 4  ;;  %s720_s9 = int_to_ptr.hbm [resolvable:$true] %s719_s9 }
  0x39   : > { %v334_v35 = vsel %vm333_vm8, %v517_v6, %v326_v32  ;;  %s721_s11 = scalar_lea.hbm %s720_s9, 24  ;;  %p726_p7 = scmp.lt.s32.totalorder %s720_s9, %s997_s3 }
  0x3a   : > { %v308_v15 = vsub.f32 %v294_v1, %v306_v10  ;;  %v311_v16 = vsub.f32 %v515_v2, %v306_v10  ;;  %v319_v17 = vsub.f32 %v516_v3, %v306_v10  ;;  %v327_v18 = vsub.f32 %v517_v6, %v306_v10  ;;  %p722_p4 = scmp.ne.s32.totalorder %s720_s9, %s721_s11  ;;  %p727_p8 = scmp.lt.s32.totalorder %s725_s22, %s721_s11 }
  0x3c   : > { %v309_v20 = vmul.f32 1.442695, %v308_v15  ;;  %v312_v21 = vmul.f32 1.442695, %v311_v16  ;;  %v320_v22 = vmul.f32 1.442695, %v319_v17  ;;  %p723_p5 = pnand %p722_p4, %p873_p9  ;;  %p728_p10 = por %p727_p8, %p726_p7 }
  0x3d   : > { %v518_v12 = vld [vmem:[%s944_s4 + $0x8] sm:$0x3]  ;;  %v328_v23 = vmul.f32 1.442695, %v327_v18  ;;  %v342_v37 = vld [vmem:[%s944_s4] sm:$0x3] }
  0x3e   : > { %v520_v13 = vld [vmem:[%s944_s4 + $0x10] sm:$0x3]  ;;  %v347_v19 = vadd.f32 %v518_v12, %v341_v11  ;;  %605 = vpow2.f32 %v309_v20  ;;  %p724_p6 = pneg %p723_p5 }
  0x3f   : > { %v351_v14 = vadd.f32 %v520_v13, %v339_v5  ;;  %607 = vpow2.f32 %v312_v21 }
  0x40   : > { %519 = vst [vmem:[%s944_s4 + $0x8] sm:$0x3] %v347_v19  ;;  %609 = vpow2.f32 %v320_v22  ;;  %p729_p13 = pnand %p728_p10, %p724_p6 }
  0x41   : > { %521 = vst [vmem:[%s944_s4 + $0x10] sm:$0x3] %v351_v14  ;;  %611 = vpow2.f32 %v328_v23 }
  0x44   : > { %v606_v24 = vpop.eup %605 }
  0x45   : > { %v608_v25 = vpop.eup %607 }
  0x46   : > { %v610_v26 = vpop.eup %609  ;;  %v314_v27 = vadd.f32 %v608_v25, %v606_v24 }
  0x47   : > { %v612_v28 = vpop.eup %611 }
  0x48   : > { %v322_v29 = vadd.f32 %v610_v26, %v314_v27 }
  0x4a   : > { %v330_v30 = vadd.f32 %v612_v28, %v322_v29 }
  0x4c   : > { %613 = vlog2.f32 %v330_v30 }
  0x52   : > { %v614_v33 = vpop.eup %613 }
  0x53   : > { %v336_v34 = vmul.f32 0.6931472, %v614_v33 }
  0x55   : > { %v337_v36 = vadd.f32 %v336_v34, %v306_v10 }
  0x57   : > { %v338_v38 = vsub.f32 %v337_v36, %v334_v35 }
  0x59   : > { %v343_v39 = vadd.f32 %v342_v37, %v338_v38 }
  0x5b   : > { %344 = vst [vmem:[%s944_s4] sm:$0x3] %v343_v39 }
  0x5c   : > { %732 = shalt.err (!%p729_p13)
}
  0x5d   : > { %s796_s30 = smov 128   ;;  %s797_s1 = smov 8  }
  0x5e   : > { %534 = dma.vmem_to_hbm [thread:$0]  (%p873_p9), %s367_s10, 384, %s369_s29, %s354_s15, %s796_s30, %s796_s30, %s797_s1  }
  0x5f PF: > { %s383_s2 = sand.u32 1, %s771_s12   ;;  %p547_p0 = pnand %p503_p12, %p880_p11 }
  0x60   : > { %s384_s14 = scalar_lea.sflag [#allocation4], %s383_s2 }
  0x61   : > { %p548_p1 = pneg %p547_p0 }
  0x63   : > { %766 = dma.done.wait (%p548_p1), %s384_s14, 384  }
  0x64   : > { %768 = vsyncadd (%p548_p1), %s384_s14, 4294966912  ;;  %s22_s17 = sadd.s32 1, %s791_s17   ;;  %s1015_s20 = sld [smem:[#allocation12_spill]] }
  0x65   : > { %p19_p2 = scmp.ge.s32.totalorder %s22_s17, 4   ;;  %s1016_s14 = sld [smem:[#allocation14_spill]] }
  0x66   : > { %s1017_s25 = sld [smem:[#allocation13_spill]]  ;;  %s1018_s12 = smov %s775_s13 }
  0x67   : > { %s1020_s15 = smov %s787_s16 }
  0x68   :  { %21 = sbr.rel (!%p19_p2) target bundleno = 11 (0xb), region = 110 }
  0x6a   : > { %s1019_s13 = smov %s1015_s20 }
  0x6c   : > { %s1021_s16 = smov %s1017_s25 }
  0x6d   :  { %390 = vsyncpa [#allocation3], 1 }
  0x6e   :  { %392 = vsyncpa [#allocation3 + $0x1], 1 }
  0x6f   :  { %393 = vsyncpa [#allocation6], 1 }
  0x70   :  { %395 = vsyncpa [#allocation6 + $0x1], 1 }
  0x71   :  { %396 = vsyncpa [#allocation4], 1 }
  0x72   :  { %398 = vsyncpa [#allocation4 + $0x1], 1 }

</bundles_post_ra>
